<compile_context>
chip_gen: v7x
topology: tpu7x:2x2x1
jax: 0.10.0
libtpu: 0.0.40
codegen_flags: <defaults>
</compile_context>

<pallas_src>
import jax
import jax.numpy as jnp
from jax import lax
from jax.experimental import pallas as pl
from jax.experimental.pallas import tpu as pltpu


def _mlp_kernel(x_ref, w1_ref, b1_ref, w2_ref, b2_ref, w3_ref, b3_ref,
                w4t_ref, b4_ref, o_ref):
    seq = x_ref.shape[0]
    tile_b = x_ref.shape[1]
    hidden = w1_ref.shape[2]
    out_dim = o_ref.shape[1]
    bf16 = jnp.bfloat16

    # fc1: x_flat[b, s*feat + f] == x[s, b, f], so
    #   x_flat @ W1 == sum_s x[s] @ W1.reshape(seq, feat, hidden)[s]
    # -> contract over (seq, feat) in-kernel; no HBM transpose of x needed.
    h = jnp.zeros((tile_b, hidden), jnp.float32)
    for s in range(seq):  # static, small (seq == 8)
        h = h + jnp.dot(x_ref[s].astype(bf16), w1_ref[s],
                        preferred_element_type=jnp.float32)
    h = jnp.maximum(h + b1_ref[...], 0.0)

    # h1 + ReLU
    h = jnp.dot(h.astype(bf16), w2_ref[...], preferred_element_type=jnp.float32)
    h = jnp.maximum(h + b2_ref[...], 0.0)

    # h2 + ReLU
    h = jnp.dot(h.astype(bf16), w3_ref[...], preferred_element_type=jnp.float32)
    h = jnp.maximum(h + b3_ref[...], 0.0)

    # fc2 (w4t is passed transposed: (out_dim, hidden_dim2))
    if out_dim == 1:
        # N=1 matmul wastes the MXU; VPU multiply + XLU lane reduction instead.
        logits = jnp.sum(h * w4t_ref[...].astype(jnp.float32),
                         axis=-1, keepdims=True) + b4_ref[...]
    else:
        logits = lax.dot_general(
            h.astype(bf16), w4t_ref[...],
            dimension_numbers=(((1,), (1,)), ((), ())),
            preferred_element_type=jnp.float32) + b4_ref[...]

    # softmax over the feature axis (PyTorch nn.Softmax(dim=1)).
    if out_dim == 1:
        # softmax of a single logit is identically 1.0 (matches the module).
        o_ref[...] = jnp.ones_like(logits)
    else:
        m = jnp.max(logits, axis=-1, keepdims=True)
        e = jnp.exp(logits - m)
        s = jnp.sum(e, axis=-1, keepdims=True)
        o_ref[...] = e * pl.reciprocal(s, approx=True)   # EUP recip (free slot)


def mlp_simple_pallas(x, params, *, tile_b_max=512):
    """x: (seq, batch, feat) f32 with seq*feat == input_dim.
    Returns softmax output of shape (batch, output_dim), f32."""
    w1, b1, w2, b2, w3, b3, w4, b4 = params
    seq, batch, feat = x.shape
    in_dim, hidden = w1.shape
    assert seq * feat == in_dim, (seq, feat, in_dim)
    out_dim = w4.shape[1]

    # One-time weight prep (tiny): reshape W1 for the (seq, feat) contraction,
    # transpose W4, cast matmul operands to bf16. These stay resident in VMEM
    # across all grid steps thanks to the constant index_maps below.
    w1r = w1.reshape(seq, feat, hidden).astype(jnp.bfloat16)
    w2b = w2.astype(jnp.bfloat16)
    w3b = w3.astype(jnp.bfloat16)
    w4t = w4.T.astype(jnp.bfloat16)            # (out_dim, hidden_dim2)
    b1f = b1.astype(jnp.float32)
    b2f = b2.astype(jnp.float32)
    b3f = b3.astype(jnp.float32)
    b4f = b4.astype(jnp.float32)

    # Batch tiling: tile must be a multiple of 8 (sublane); pad batch so the
    # grid divides evenly, slice the padding off afterwards.
    def round_up(a, m):
        return (a + m - 1) // m * m

    tile_b = round_up(min(tile_b_max, round_up(batch, 8)), 8)
    padded = round_up(batch, tile_b)
    if padded != batch:
        x = jnp.pad(x, ((0, 0), (0, padded - batch), (0, 0)))
    grid = (padded // tile_b,)

    def const_spec(shape):
        return pl.BlockSpec(shape, lambda i: tuple(0 for _ in shape))

    out = pl.pallas_call(
        _mlp_kernel,
        out_shape=jax.ShapeDtypeStruct((padded, out_dim), jnp.float32),
        grid=grid,
        in_specs=[
            pl.BlockSpec((seq, tile_b, feat), lambda i: (0, i, 0)),  # x tile
            const_spec(w1r.shape), const_spec(b1f.shape),
            const_spec(w2b.shape), const_spec(b2f.shape),
            const_spec(w3b.shape), const_spec(b3f.shape),
            const_spec(w4t.shape), const_spec(b4f.shape),
        ],
        out_specs=pl.BlockSpec((tile_b, out_dim), lambda i: (i, 0)),
        compiler_params=pltpu.CompilerParams(
            dimension_semantics=("parallel",)),   # 2-TC split on v7x
    )(x, w1r, b1f, w2b, b2f, w3b, b3f, w4t, b4f)
    return out[:batch]


def init_params(key, input_dim=96, hidden_dim=70, hidden_dim1=50,
                hidden_dim2=20, output_dim=1):
    """Deterministic init mimicking nn.Linear's U(-1/sqrt(fan_in), 1/sqrt(fan_in)).
    Weights stored as (in, out) for the x @ W convention."""
    dims = [(input_dim, hidden_dim), (hidden_dim, hidden_dim1),
            (hidden_dim1, hidden_dim2), (hidden_dim2, output_dim)]
    params = []
    for (fan_in, fan_out) in dims:
        key, kw, kb = jax.random.split(key, 3)
        bound = 1.0 / jnp.sqrt(float(fan_in))
        w = jax.random.uniform(kw, (fan_in, fan_out), jnp.float32, -bound, bound)
        b = jax.random.uniform(kb, (1, fan_out), jnp.float32, -bound, bound)
        params += [w, b]
    return tuple(params)


def mlp_simple_ref_f32(x, params):
    """Literal f32 transcription of the PyTorch forward."""
    w1, b1, w2, b2, w3, b3, w4, b4 = params
    xb = jnp.transpose(x, (1, 0, 2)).reshape(x.shape[1], -1)
    h = jnp.maximum(xb @ w1 + b1, 0.0)
    h = jnp.maximum(h @ w2 + b2, 0.0)
    h = jnp.maximum(h @ w3 + b3, 0.0)
    logits = h @ w4 + b4
    return jax.nn.softmax(logits, axis=1)


def mlp_simple_ref_bf16(x, params):
    """Reference matching the kernel numerics (bf16 MXU inputs, f32 accumulate)."""
    w1, b1, w2, b2, w3, b3, w4, b4 = params
    bf = jnp.bfloat16
    f32 = jnp.float32
    xb = jnp.transpose(x, (1, 0, 2)).reshape(x.shape[1], -1).astype(bf)
    h = jnp.maximum(jnp.dot(xb, w1.astype(bf), preferred_element_type=f32) + b1, 0.0)
    h = jnp.maximum(jnp.dot(h.astype(bf), w2.astype(bf), preferred_element_type=f32) + b2, 0.0)
    h = jnp.maximum(jnp.dot(h.astype(bf), w3.astype(bf), preferred_element_type=f32) + b3, 0.0)
    logits = jnp.dot(h.astype(bf), w4.astype(bf), preferred_element_type=f32) + b4
    return jax.nn.softmax(logits, axis=1)


if __name__ == "__main__":
    key = jax.random.PRNGKey(0)
    key, kx, kp = jax.random.split(key, 3)

    # Module spec: input_dim=96 -> seq=8, feat=12; small batch=4.
    seq, batch, feat = 8, 4, 12
    x = jax.random.normal(kx, (seq, batch, feat), jnp.float32)
    params = init_params(kp)                       # output_dim = 1 (default)

    out = jax.block_until_ready(mlp_simple_pallas(x, params))
    assert out.shape == (batch, 1), out.shape
    ref = mlp_simple_ref_f32(x, params)
    # With output_dim=1 the softmax is identically 1.0 in both implementations.
    assert jnp.allclose(out, ref, atol=1e-6), (out, ref)

    # Sanity-check the general (out_dim > 1) path, multi-step batch grid,
    # weight residency and batch padding, against a bf16-matched reference.
    # Tolerance covers the approx EUP reciprocal (~2^-12 relative error).
    key, kx2, kp2 = jax.random.split(key, 3)
    batch2 = 20
    x2 = jax.random.normal(kx2, (seq, batch2, feat), jnp.float32)
    params2 = init_params(kp2, output_dim=8)
    out2 = jax.block_until_ready(mlp_simple_pallas(x2, params2, tile_b_max=8))
    ref2 = mlp_simple_ref_bf16(x2, params2)
    assert out2.shape == (batch2, 8), out2.shape
    assert jnp.allclose(out2, ref2, atol=2e-3, rtol=2e-3), (
        float(jnp.max(jnp.abs(out2 - ref2))))

    print("KERNEL_OK")
</pallas_src>

<mosaic_0001>
module attributes {stable_mosaic.version = 11 : i64} {
  func.func @_mlp_kernel(%arg0: i32, %arg1: memref<8x8x12xf32, #tpu.memory_space<vmem>>, %arg2: memref<8x12x70xbf16, #tpu.memory_space<vmem>>, %arg3: memref<1x70xf32, #tpu.memory_space<vmem>>, %arg4: memref<70x50xbf16, #tpu.memory_space<vmem>>, %arg5: memref<1x50xf32, #tpu.memory_space<vmem>>, %arg6: memref<50x20xbf16, #tpu.memory_space<vmem>>, %arg7: memref<1x20xf32, #tpu.memory_space<vmem>>, %arg8: memref<1x20xbf16, #tpu.memory_space<vmem>>, %arg9: memref<1x1xf32, #tpu.memory_space<vmem>>, %arg10: memref<8x1xf32, #tpu.memory_space<vmem>>) attributes {dimension_semantics = [#tpu.dimension_semantics<parallel>], iteration_bounds = array<i64: 1>, scalar_prefetch = 0 : i64, scratch_operands = 0 : i64, tpu.core_type = #tpu.core_type<tc>, window_params = [{transform_indices = @transform_0, window_bounds = array<i64: 8, 8, 12>}, {pipeline_mode = #tpu.pipeline_mode<synchronous>, transform_indices = @transform_1, window_bounds = array<i64: 8, 12, 70>}, {pipeline_mode = #tpu.pipeline_mode<synchronous>, transform_indices = @transform_2, window_bounds = array<i64: 1, 70>}, {pipeline_mode = #tpu.pipeline_mode<synchronous>, transform_indices = @transform_3, window_bounds = array<i64: 70, 50>}, {pipeline_mode = #tpu.pipeline_mode<synchronous>, transform_indices = @transform_4, window_bounds = array<i64: 1, 50>}, {pipeline_mode = #tpu.pipeline_mode<synchronous>, transform_indices = @transform_5, window_bounds = array<i64: 50, 20>}, {pipeline_mode = #tpu.pipeline_mode<synchronous>, transform_indices = @transform_6, window_bounds = array<i64: 1, 20>}, {pipeline_mode = #tpu.pipeline_mode<synchronous>, transform_indices = @transform_7, window_bounds = array<i64: 1, 20>}, {pipeline_mode = #tpu.pipeline_mode<synchronous>, transform_indices = @transform_8, window_bounds = array<i64: 1, 1>}, {transform_indices = @transform_9, window_bounds = array<i64: 8, 1>}]} {
    %cst = arith.constant 1.000000e+00 : f32
    %0 = vector.broadcast %cst : f32 to vector<8x1xf32>
    %c0 = arith.constant 0 : index
    %c0_0 = arith.constant 0 : index
    %1 = vector.load %arg10[%c0, %c0_0] : memref<8x1xf32, #tpu.memory_space<vmem>>, vector<8x1xf32>
    tpu.vector_store %arg10[%c0, %c0_0], %0 {strides = array<i32>} : memref<8x1xf32, #tpu.memory_space<vmem>>, vector<8x1xf32>,
    return
  }
  func.func @transform_0(%arg0: i32) -> (i32, i32, i32) {
    %c0_i32 = arith.constant 0 : i32
    %c0_i32_0 = arith.constant 0 : i32
    %c0_i32_1 = arith.constant 0 : i32
    return %c0_i32, %arg0, %c0_i32_0 : i32, i32, i32
  }
  func.func @transform_1(%arg0: i32) -> (i32, i32, i32) {
    %c0_i32 = arith.constant 0 : i32
    %c0_i32_0 = arith.constant 0 : i32
    %c0_i32_1 = arith.constant 0 : i32
    %c0_i32_2 = arith.constant 0 : i32
    return %c0_i32, %c0_i32_0, %c0_i32_1 : i32, i32, i32
  }
  func.func @transform_2(%arg0: i32) -> (i32, i32) {
    %c0_i32 = arith.constant 0 : i32
    %c0_i32_0 = arith.constant 0 : i32
    %c0_i32_1 = arith.constant 0 : i32
    return %c0_i32, %c0_i32_0 : i32, i32
  }
  func.func @transform_3(%arg0: i32) -> (i32, i32) {
    %c0_i32 = arith.constant 0 : i32
    %c0_i32_0 = arith.constant 0 : i32
    %c0_i32_1 = arith.constant 0 : i32
    return %c0_i32, %c0_i32_0 : i32, i32
  }
  func.func @transform_4(%arg0: i32) -> (i32, i32) {
    %c0_i32 = arith.constant 0 : i32
    %c0_i32_0 = arith.constant 0 : i32
    %c0_i32_1 = arith.constant 0 : i32
    return %c0_i32, %c0_i32_0 : i32, i32
  }
  func.func @transform_5(%arg0: i32) -> (i32, i32) {
    %c0_i32 = arith.constant 0 : i32
    %c0_i32_0 = arith.constant 0 : i32
    %c0_i32_1 = arith.constant 0 : i32
    return %c0_i32, %c0_i32_0 : i32, i32
  }
  func.func @transform_6(%arg0: i32) -> (i32, i32) {
    %c0_i32 = arith.constant 0 : i32
    %c0_i32_0 = arith.constant 0 : i32
    %c0_i32_1 = arith.constant 0 : i32
    return %c0_i32, %c0_i32_0 : i32, i32
  }
  func.func @transform_7(%arg0: i32) -> (i32, i32) {
    %c0_i32 = arith.constant 0 : i32
    %c0_i32_0 = arith.constant 0 : i32
    %c0_i32_1 = arith.constant 0 : i32
    return %c0_i32, %c0_i32_0 : i32, i32
  }
  func.func @transform_8(%arg0: i32) -> (i32, i32) {
    %c0_i32 = arith.constant 0 : i32
    %c0_i32_0 = arith.constant 0 : i32
    %c0_i32_1 = arith.constant 0 : i32
    return %c0_i32, %c0_i32_0 : i32, i32
  }
  func.func @transform_9(%arg0: i32) -> (i32, i32) {
    %c0_i32 = arith.constant 0 : i32
    %c0_i32_0 = arith.constant 0 : i32
    return %arg0, %c0_i32 : i32, i32
  }
}

</mosaic_0001>

<bundles_post_ra>
// kernel: tpu_custom_call.1
= control target key start
LH: loop header
LB: loop body
LE: loop exit
PB: predicated region body
PF: predicated region fallthrough
CT: control target
= control target key end

     0   :  { %vm34_vm0 = vcmask 7168   ;;  %v41_v0 = vmov 1.0   ;;  %s95_s0 = inlined_call_operand.vmem [shape: f32[8,8,12], index: 0, kind: input, shape index: {}]   ;;  %s96_s1 = inlined_call_operand.vmem [shape: bf16[8,12,70], index: 1, kind: input, shape index: {}]   ;;  %s97_s2 = inlined_call_operand.vmem [shape: f32[1,70], index: 2, kind: input, shape index: {}]   ;;  %s98_s3 = inlined_call_operand.vmem [shape: bf16[70,50], index: 3, kind: input, shape index: {}]   ;;  %s99_s4 = inlined_call_operand.vmem [shape: f32[1,50], index: 4, kind: input, shape index: {}]   ;;  %s100_s5 = inlined_call_operand.vmem [shape: bf16[50,20], index: 5, kind: input, shape index: {}]   ;;  %s101_s6 = inlined_call_operand.vmem [shape: f32[1,20], index: 6, kind: input, shape index: {}]   ;;  %s102_s7 = inlined_call_operand.vmem [shape: bf16[1,20], index: 7, kind: input, shape index: {}]   ;;  %s103_s8 = inlined_call_operand.<no memory space> [shape: f32[1,1], index: 8, kind: input, shape index: {}]   ;;  %s104_s9 = inlined_call_operand.vmem [shape: f32[8,1], index: 9, kind: output, shape index: {}]  }
   0x1   :  { %35 = vst.msk [vmem:[%s104_s9] sm:$0xff] %vm34_vm0, %v41_v0 }

</bundles_post_ra>
